<compile_context>
chip_gen: v5e
topology: v5e:2x2
jax: 0.10.0
libtpu: 0.0.40
codegen_flags: <defaults>
</compile_context>

<pallas_src>
import math
import numpy as np
import jax
import jax.numpy as jnp
from jax.experimental import pallas as pl
from jax.experimental.pallas import tpu as pltpu

SCALAR_DIM = 8          # module default 20; must be even for sinusoidal emb
ORI_FEAT_DIM = 16       # module default 1024
EMBED_DIM = 32          # module default 1024
NUM_LAYERS = 2
KERNEL_SIZE = 5
SPLINE_K = KERNEL_SIZE * KERNEL_SIZE  # 2-D pseudo coordinates -> 25 kernels
ROW_TILE = 256          # row-tile for node/edge dimension of the matmul kernels


# ---------------------------- Pallas kernels ----------------------------

def _linear3_kernel(x1_ref, x2_ref, x3_ref, wa_ref, wb_ref, wc_ref, b_ref, o_ref):
    # Fused "concat + linear": o = [x1|x2|x3] @ [wa;wb;wc] + b  without ever
    # materializing the concatenated activation in HBM.
    acc = jnp.dot(x1_ref[...].astype(jnp.bfloat16), wa_ref[...].astype(jnp.bfloat16),
                  preferred_element_type=jnp.float32)
    acc = acc + jnp.dot(x2_ref[...].astype(jnp.bfloat16), wb_ref[...].astype(jnp.bfloat16),
                        preferred_element_type=jnp.float32)
    acc = acc + jnp.dot(x3_ref[...].astype(jnp.bfloat16), wc_ref[...].astype(jnp.bfloat16),
                        preferred_element_type=jnp.float32)
    o_ref[...] = acc + b_ref[...]


def linear3(x1, x2, x3, wa, wb, wc, b):
    m = x1.shape[0]
    n = wa.shape[1]
    tm = m if m <= ROW_TILE else ROW_TILE
    k_total = x1.shape[1] + x2.shape[1] + x3.shape[1]
    return pl.pallas_call(
        _linear3_kernel,
        out_shape=jax.ShapeDtypeStruct((m, n), jnp.float32),
        grid=(pl.cdiv(m, tm),),
        in_specs=[pl.BlockSpec((tm, x1.shape[1]), lambda i: (i, 0)),
                  pl.BlockSpec((tm, x2.shape[1]), lambda i: (i, 0)),
                  pl.BlockSpec((tm, x3.shape[1]), lambda i: (i, 0)),
                  pl.BlockSpec(wa.shape, lambda i: (0, 0)),
                  pl.BlockSpec(wb.shape, lambda i: (0, 0)),
                  pl.BlockSpec(wc.shape, lambda i: (0, 0)),
                  pl.BlockSpec((1, n), lambda i: (0, 0))],
        out_specs=pl.BlockSpec((tm, n), lambda i: (i, 0)),
        compiler_params=pltpu.CompilerParams(dimension_semantics=("parallel",)),
        cost_estimate=pl.CostEstimate(
            flops=2 * m * k_total * n, transcendentals=0,
            bytes_accessed=4 * (m * k_total + k_total * n + m * n)),
    )(x1, x2, x3, wa, wb, wc, b.reshape(1, n))


def _linear_kernel(x_ref, w_ref, b_ref, o_ref):
    o_ref[...] = jnp.dot(x_ref[...].astype(jnp.bfloat16),
                         w_ref[...].astype(jnp.bfloat16),
                         preferred_element_type=jnp.float32) + b_ref[...]


def linear(x, w, b):
    m, k = x.shape
    n = w.shape[1]
    tm = m if m <= ROW_TILE else ROW_TILE
    return pl.pallas_call(
        _linear_kernel,
        out_shape=jax.ShapeDtypeStruct((m, n), jnp.float32),
        grid=(pl.cdiv(m, tm),),
        in_specs=[pl.BlockSpec((tm, k), lambda i: (i, 0)),
                  pl.BlockSpec((k, n), lambda i: (0, 0)),
                  pl.BlockSpec((1, n), lambda i: (0, 0))],
        out_specs=pl.BlockSpec((tm, n), lambda i: (i, 0)),
        compiler_params=pltpu.CompilerParams(dimension_semantics=("parallel",)),
        cost_estimate=pl.CostEstimate(
            flops=2 * m * k * n, transcendentals=0,
            bytes_accessed=4 * (m * k + k * n + m * n)),
    )(x, w, b.reshape(1, n))


def _matmul_kernel(x_ref, w_ref, o_ref):
    o_ref[...] = jnp.dot(x_ref[...].astype(jnp.bfloat16),
                         w_ref[...].astype(jnp.bfloat16),
                         preferred_element_type=jnp.float32)


def matmul(x, w):
    """Row-tiled (M, K) @ (K, N) with bf16 MXU operands and f32 accumulation."""
    m, k = x.shape
    n = w.shape[1]
    tm = m if m <= ROW_TILE else ROW_TILE
    return pl.pallas_call(
        _matmul_kernel,
        out_shape=jax.ShapeDtypeStruct((m, n), jnp.float32),
        grid=(pl.cdiv(m, tm),),
        in_specs=[pl.BlockSpec((tm, k), lambda i: (i, 0)),
                  pl.BlockSpec((k, n), lambda i: (0, 0))],
        out_specs=pl.BlockSpec((tm, n), lambda i: (i, 0)),
        compiler_params=pltpu.CompilerParams(dimension_semantics=("parallel",)),
        cost_estimate=pl.CostEstimate(
            flops=2 * m * k * n, transcendentals=0,
            bytes_accessed=4 * (m * k + k * n + m * n)),
    )(x, w)


def _conv_combine_kernel(agg_ref, x_ref, root_ref, b_ref, o_ref):
    # Fused SplineConv epilogue: tanh(agg + x @ root + bias)
    z = jnp.dot(x_ref[...].astype(jnp.bfloat16),
                root_ref[...].astype(jnp.bfloat16),
                preferred_element_type=jnp.float32)
    o_ref[...] = jnp.tanh(agg_ref[...] + z + b_ref[...])


def conv_combine(agg, x, root, b):
    m, k = x.shape
    n = root.shape[1]
    tm = m if m <= ROW_TILE else ROW_TILE
    return pl.pallas_call(
        _conv_combine_kernel,
        out_shape=jax.ShapeDtypeStruct((m, n), jnp.float32),
        grid=(pl.cdiv(m, tm),),
        in_specs=[pl.BlockSpec((tm, n), lambda i: (i, 0)),
                  pl.BlockSpec((tm, k), lambda i: (i, 0)),
                  pl.BlockSpec((k, n), lambda i: (0, 0)),
                  pl.BlockSpec((1, n), lambda i: (0, 0))],
        out_specs=pl.BlockSpec((tm, n), lambda i: (i, 0)),
        compiler_params=pltpu.CompilerParams(dimension_semantics=("parallel",)),
    )(agg, x, root, b.reshape(1, n))


def _msg_diff_kernel(xt_ref, xps_ref, xpt_ref, ds_ref, dt_ref):
    # per-batch block: Xt (1,Ns,Nt), x_pad_src (1,Ns,D), x_pad_trg (1,Nt,D)
    # Emits both diffs, reusing the single Xt tile already DMA'd to VMEM
    # (Xt^T built in VMEM by the XLU -> no HBM transpose of the alignment mat).
    xt = xt_ref[0]
    xps = xps_ref[0]
    xpt = xpt_ref[0]
    tmsg = jnp.dot(xt.astype(jnp.bfloat16), xpt.astype(jnp.bfloat16),
                   preferred_element_type=jnp.float32)
    smsg = jnp.dot(xt.T.astype(jnp.bfloat16), xps.astype(jnp.bfloat16),
                   preferred_element_type=jnp.float32)
    ds_ref[0] = xps - tmsg
    dt_ref[0] = xpt - smsg


def msg_diff(Xt, x_pad_src, x_pad_trg):
    B, Ns, Nt = Xt.shape
    D = x_pad_src.shape[2]
    return pl.pallas_call(
        _msg_diff_kernel,
        out_shape=(jax.ShapeDtypeStruct((B, Ns, D), jnp.float32),
                   jax.ShapeDtypeStruct((B, Nt, D), jnp.float32)),
        grid=(B,),
        in_specs=[pl.BlockSpec((1, Ns, Nt), lambda i: (i, 0, 0)),
                  pl.BlockSpec((1, Ns, D), lambda i: (i, 0, 0)),
                  pl.BlockSpec((1, Nt, D), lambda i: (i, 0, 0))],
        out_specs=(pl.BlockSpec((1, Ns, D), lambda i: (i, 0, 0)),
                   pl.BlockSpec((1, Nt, D), lambda i: (i, 0, 0))),
        compiler_params=pltpu.CompilerParams(dimension_semantics=("parallel",)),
    )(Xt, x_pad_src, x_pad_trg)


def _sim_softmax_kernel(xs_ref, xt_ref, m_ref, o_ref):
    # dot_general contracting last dims: no RHS transpose materialization.
    s = jax.lax.dot_general(
        xs_ref[0].astype(jnp.bfloat16), xt_ref[0].astype(jnp.bfloat16),
        (((1,), (1,)), ((), ())), preferred_element_type=jnp.float32)
    m = m_ref[0] > 0.5
    # logits / max / exp / normalization stay in f32 (bf16 cannot hold -1e30)
    neg = jnp.where(m, s, -1e30)
    mx = jnp.max(neg, axis=-1, keepdims=True)
    p = jnp.where(m, jnp.exp(neg - mx), 0.0)
    denom = jnp.sum(p, axis=-1, keepdims=True)
    o_ref[0] = p / jnp.maximum(denom, 1e-30)   # fully-masked rows -> 0 (matches torch)


def sim_masked_softmax(x_src_d, x_trg_d, mask_f):
    B, Ns, D = x_src_d.shape
    Nt = x_trg_d.shape[1]
    return pl.pallas_call(
        _sim_softmax_kernel,
        out_shape=jax.ShapeDtypeStruct((B, Ns, Nt), jnp.float32),
        grid=(B,),
        in_specs=[pl.BlockSpec((1, Ns, D), lambda i: (i, 0, 0)),
                  pl.BlockSpec((1, Nt, D), lambda i: (i, 0, 0)),
                  pl.BlockSpec((1, Ns, Nt), lambda i: (i, 0, 0))],
        out_specs=pl.BlockSpec((1, Ns, Nt), lambda i: (i, 0, 0)),
        compiler_params=pltpu.CompilerParams(dimension_semantics=("parallel",)),
    )(x_src_d, x_trg_d, mask_f)


# ------------------------------ glue (JAX) ------------------------------

def sinusoidal_pos_emb(x, dim):
    half = dim // 2
    scale = math.log(10000.0) / (half - 1)
    freqs = jnp.exp(-scale * jnp.arange(half, dtype=jnp.float32))
    args = x.astype(jnp.float32)[:, None] * freqs[None, :]
    return jnp.concatenate([jnp.sin(args), jnp.cos(args)], axis=-1)


def spline_basis_deg1(pseudo, kernel_size):
    # open B-spline, degree 1, 2-D pseudo coords in [0, 1]
    v = jnp.clip(pseudo, 0.0, 1.0) * (kernel_size - 1)
    i0 = jnp.clip(jnp.floor(v), 0, kernel_size - 2).astype(jnp.int32)
    frac = v - i0.astype(jnp.float32)
    oh0 = jax.nn.one_hot(i0, kernel_size, dtype=jnp.float32)
    oh1 = jax.nn.one_hot(i0 + 1, kernel_size, dtype=jnp.float32)
    bd = (1.0 - frac)[..., None] * oh0 + frac[..., None] * oh1   # (E, 2, ks)
    b = jnp.einsum('ea,eb->eab', bd[:, 0], bd[:, 1])
    return b.reshape(pseudo.shape[0], kernel_size * kernel_size)


def to_dense_batch(x, batch_idx, pos_idx, batch_size, max_nodes):
    out = jnp.zeros((batch_size, max_nodes, x.shape[-1]), x.dtype)
    return out.at[batch_idx, pos_idx].set(x)


def graph_transformer_matching_forward(params, noisy, s_idx, t_idx,
                                        graph_s, graph_t, B, Ns, Nt):
    s_batch, s_pos = s_idx   # static index arrays == positions where s_mask is True
    t_batch, t_pos = t_idx
    n_s = s_batch.shape[0]
    n_t = t_batch.shape[0]
    Xt = noisy['Xt'].astype(jnp.float32)

    # --- loop-invariant scalar features, src/trg fused along the row axis ---
    time_emb = sinusoidal_pos_emb(noisy['t'], SCALAR_DIM)
    num_aligned_src = sinusoidal_pos_emb(Xt.sum(-1)[s_batch, s_pos] / 10.0, SCALAR_DIM)
    num_aligned_trg = sinusoidal_pos_emb(Xt.sum(1)[t_batch, t_pos] / 10.0, SCALAR_DIM)
    na_cat = jnp.concatenate([num_aligned_src, num_aligned_trg], 0)
    tf_cat = jnp.concatenate([time_emb[s_batch], time_emb[t_batch]], 0)

    # --- loop-invariant spline basis / edge bookkeeping (src & trg fused) ---
    src_s, dst_s = graph_s['edge_index'][0], graph_s['edge_index'][1]
    src_t, dst_t = graph_t['edge_index'][0], graph_t['edge_index'][1]
    e_s = src_s.shape[0]
    basis_cat = jnp.concatenate(
        [spline_basis_deg1(graph_s['edge_attr'], KERNEL_SIZE),
         spline_basis_deg1(graph_t['edge_attr'], KERNEL_SIZE)], 0)
    deg_s = jnp.zeros((n_s,), jnp.float32).at[dst_s].add(1.0)
    deg_t = jnp.zeros((n_t,), jnp.float32).at[dst_t].add(1.0)

    x_src = graph_s['x']
    x_trg = graph_t['x']
    for i in range(NUM_LAYERS):
        lp = params['linears'][i]
        c1 = x_src.shape[1]
        wa = lp['w'][:c1]                       # rows for x
        wb = lp['w'][c1:c1 + SCALAR_DIM]        # rows for num_aligned
        wc = lp['w'][c1 + SCALAR_DIM:]          # rows for time features

        # shared weights -> one fused call over src+trg rows, concat fused in-kernel
        x_in = linear3(jnp.concatenate([x_src, x_trg], 0), na_cat, tf_cat,
                       wa, wb, wc, lp['b'])
        x_in_src, x_in_trg = x_in[:n_s], x_in[n_s:]

        x_pad_src = to_dense_batch(x_in_src, s_batch, s_pos, B, Ns)
        x_pad_trg = to_dense_batch(x_in_trg, t_batch, t_pos, B, Nt)

        # both message matmuls + diffs in one per-batch kernel (Xt reused)
        diff_src_pad, diff_trg_pad = msg_diff(Xt, x_pad_src, x_pad_trg)
        diff_src = diff_src_pad[s_batch, s_pos]
        diff_trg = diff_trg_pad[t_batch, t_pos]

        cat_src = jnp.concatenate([x_in_src, diff_src], -1)
        cat_trg = jnp.concatenate([x_in_trg, diff_trg], -1)

        cp = params['convs'][i]
        cin = cat_src.shape[1]
        cout = cp['weight'].shape[2]

        # SplineConv messages as ONE big matmul over all edges of both graphs:
        #   lhs[e, k*Cin + c] = basis[e, k] * x_j[e, c];  w_flat = (K*Cin, Cout)
        # TODO(synk): kernel-index ordering of torch_spline_conv is not reproduced
        # bit-exactly (weights here are synthetic, semantics are equivalent).
        x_j_cat = jnp.concatenate([cat_src[src_s], cat_trg[src_t]], 0)
        lhs = (basis_cat[:, :, None] * x_j_cat[:, None, :]).reshape(-1, SPLINE_K * cin)
        msg = matmul(lhs, cp['weight'].reshape(SPLINE_K * cin, cout))
        msg_s, msg_t = msg[:e_s], msg[e_s:]

        # scatter-mean (zero-degree rows have zero aggregate, so max(deg,1) is exact)
        agg_s = jnp.zeros((n_s, cout), jnp.float32).at[dst_s].add(msg_s)
        agg_s = agg_s / jnp.maximum(deg_s, 1.0)[:, None]
        agg_t = jnp.zeros((n_t, cout), jnp.float32).at[dst_t].add(msg_t)
        agg_t = agg_t / jnp.maximum(deg_t, 1.0)[:, None]

        # fused root matmul + aggregate add + bias + tanh, src/trg in one call
        out = conv_combine(jnp.concatenate([agg_s, agg_t], 0),
                           jnp.concatenate([cat_src, cat_trg], 0),
                           cp['root'], cp['bias'])
        x_src, x_trg = out[:n_s], out[n_s:]

    # cat=False -> last layer only; dropout p=0.0 -> identity; shared final Linear
    fin = linear(jnp.concatenate([x_src, x_trg], 0),
                 params['final']['w'], params['final']['b'])
    x_src_f, x_trg_f = fin[:n_s], fin[n_s:]

    x_src_d = to_dense_batch(x_src_f, s_batch, s_pos, B, Ns)
    x_trg_d = to_dense_batch(x_trg_f, t_batch, t_pos, B, Nt)

    mask_f = noisy['mask_align'].astype(jnp.float32)
    sim = sim_masked_softmax(x_src_d, x_trg_d, mask_f)   # fused matmul + masked softmax
    return sim[s_batch, s_pos]                            # == sim[s_mask]


# ---------------------------- params / inputs ----------------------------

def init_params(key):
    keys = jax.random.split(key, 16)
    params = {'linears': [], 'convs': []}
    in_dims = ([ORI_FEAT_DIM + 2 * SCALAR_DIM]
               + [EMBED_DIM + 2 * SCALAR_DIM] * (NUM_LAYERS - 1))
    ki = 0
    for i in range(NUM_LAYERS):
        w = jax.random.normal(keys[ki], (in_dims[i], EMBED_DIM),
                              jnp.float32) / np.sqrt(in_dims[i]); ki += 1
        b = jax.random.normal(keys[ki], (EMBED_DIM,), jnp.float32) * 0.01; ki += 1
        params['linears'].append({'w': w, 'b': b})
    for i in range(NUM_LAYERS):
        cin = 2 * EMBED_DIM
        w = jax.random.normal(keys[ki], (SPLINE_K, cin, EMBED_DIM),
                              jnp.float32) / np.sqrt(cin * 4.0); ki += 1
        root = jax.random.normal(keys[ki], (cin, EMBED_DIM),
                                 jnp.float32) / np.sqrt(cin); ki += 1
        params['convs'].append({'weight': w, 'root': root,
                                'bias': jnp.zeros((EMBED_DIM,), jnp.float32)})
    params['final'] = {
        'w': jax.random.normal(keys[ki], (EMBED_DIM, EMBED_DIM),
                               jnp.float32) / np.sqrt(EMBED_DIM),
        'b': jax.random.normal(keys[ki + 1], (EMBED_DIM,), jnp.float32) * 0.01,
    }
    return params


def ring_edges(counts):
    edges = []
    off = 0
    for n in counts:
        for i in range(n):
            j = (i + 1) % n
            edges.append((off + i, off + j))
            edges.append((off + j, off + i))
        off += n
    return np.asarray(edges, dtype=np.int32).T   # (2, E)


def batch_indices(counts):
    batch = np.concatenate([np.full(n, g, np.int32) for g, n in enumerate(counts)])
    pos = np.concatenate([np.arange(n, dtype=np.int32) for n in counts])
    return batch, pos


if __name__ == "__main__":
    B, Ns, Nt = 2, 8, 8
    src_counts = [6, 8]
    trg_counts = [5, 7]

    s_mask_np = np.zeros((B, Ns), bool)
    t_mask_np = np.zeros((B, Nt), bool)
    for g, n in enumerate(src_counts):
        s_mask_np[g, :n] = True
    for g, n in enumerate(trg_counts):
        t_mask_np[g, :n] = True

    s_batch_np, s_pos_np = batch_indices(src_counts)
    t_batch_np, t_pos_np = batch_indices(trg_counts)
    total_s, total_t = sum(src_counts), sum(trg_counts)

    key = jax.random.PRNGKey(0)
    (k_param, k_xs, k_xt_feat, k_attr_s, k_attr_t, k_align, k_time) = \
        jax.random.split(key, 7)

    params = init_params(k_param)

    graph_s = {
        'x': jax.random.normal(k_xs, (total_s, ORI_FEAT_DIM), jnp.float32),
        'edge_index': jnp.asarray(ring_edges(src_counts)),
        'edge_attr': jax.random.uniform(k_attr_s, (2 * total_s, 2), jnp.float32),
    }
    graph_t = {
        'x': jax.random.normal(k_xt_feat, (total_t, ORI_FEAT_DIM), jnp.float32),
        'edge_index': jnp.asarray(ring_edges(trg_counts)),
        'edge_attr': jax.random.uniform(k_attr_t, (2 * total_t, 2), jnp.float32),
    }

    valid = jnp.asarray(s_mask_np)[:, :, None] & jnp.asarray(t_mask_np)[:, None, :]
    Xt = (jax.random.uniform(k_align, (B, Ns, Nt)) > 0.5).astype(jnp.float32)
    Xt = Xt * valid.astype(jnp.float32)

    noisy = {
        't': jax.random.uniform(k_time, (B,), jnp.float32) * 100.0,
        'Xt': Xt,
        'mask_align': valid,
    }

    s_idx = (jnp.asarray(s_batch_np), jnp.asarray(s_pos_np))
    t_idx = (jnp.asarray(t_batch_np), jnp.asarray(t_pos_np))

    out = graph_transformer_matching_forward(
        params, noisy, s_idx, t_idx, graph_s, graph_t, B, Ns, Nt)
    out = jax.block_until_ready(out)

    assert out.shape == (total_s, Nt)
    assert bool(jnp.all(jnp.isfinite(out)))
    # rows should sum to ~1 over the valid targets (masked softmax)
    assert bool(jnp.all(jnp.abs(out.sum(-1) - 1.0) < 1e-3))
    print("KERNEL_OK")
</pallas_src>

<mosaic_0001>
module attributes {stable_mosaic.version = 11 : i64} {
  func.func @_linear3_kernel(%arg0: i32, %arg1: memref<26x16xf32, #tpu.memory_space<vmem>>, %arg2: memref<26x8xf32, #tpu.memory_space<vmem>>, %arg3: memref<26x8xf32, #tpu.memory_space<vmem>>, %arg4: memref<16x32xf32, #tpu.memory_space<vmem>>, %arg5: memref<8x32xf32, #tpu.memory_space<vmem>>, %arg6: memref<8x32xf32, #tpu.memory_space<vmem>>, %arg7: memref<1x32xf32, #tpu.memory_space<vmem>>, %arg8: memref<26x32xf32, #tpu.memory_space<vmem>>) attributes {dimension_semantics = [#tpu.dimension_semantics<parallel>], iteration_bounds = array<i64: 1>, scalar_prefetch = 0 : i64, scratch_operands = 0 : i64, tpu.core_type = #tpu.core_type<tc>, window_params = [{transform_indices = @transform_0, window_bounds = array<i64: 26, 16>}, {transform_indices = @transform_1, window_bounds = array<i64: 26, 8>}, {transform_indices = @transform_2, window_bounds = array<i64: 26, 8>}, {pipeline_mode = #tpu.pipeline_mode<synchronous>, transform_indices = @transform_3, window_bounds = array<i64: 16, 32>}, {pipeline_mode = #tpu.pipeline_mode<synchronous>, transform_indices = @transform_4, window_bounds = array<i64: 8, 32>}, {pipeline_mode = #tpu.pipeline_mode<synchronous>, transform_indices = @transform_5, window_bounds = array<i64: 8, 32>}, {pipeline_mode = #tpu.pipeline_mode<synchronous>, transform_indices = @transform_6, window_bounds = array<i64: 1, 32>}, {transform_indices = @transform_7, window_bounds = array<i64: 26, 32>}]} {
    %c0 = arith.constant 0 : index
    %c0_0 = arith.constant 0 : index
    %0 = vector.load %arg1[%c0, %c0_0] : memref<26x16xf32, #tpu.memory_space<vmem>>, vector<26x16xf32>
    %1 = arith.truncf %0 : vector<26x16xf32> to vector<26x16xbf16>
    %c0_1 = arith.constant 0 : index
    %c0_2 = arith.constant 0 : index
    %2 = vector.load %arg4[%c0_1, %c0_2] : memref<16x32xf32, #tpu.memory_space<vmem>>, vector<16x32xf32>
    %3 = arith.truncf %2 : vector<16x32xf32> to vector<16x32xbf16>
    %cst = arith.constant dense<0.000000e+00> : vector<26x32xf32>
    %4 = tpu.matmul %1, %3, %cst {dimension_numbers = #tpu.dot_dimension_numbers<[1], [0], [0], [1], [0, 0, 1, 1], [], []>} : vector<26x16xbf16>, vector<16x32xbf16>, vector<26x32xf32> -> vector<26x32xf32>
    %c0_3 = arith.constant 0 : index
    %c0_4 = arith.constant 0 : index
    %5 = vector.load %arg2[%c0_3, %c0_4] : memref<26x8xf32, #tpu.memory_space<vmem>>, vector<26x8xf32>
    %6 = arith.truncf %5 : vector<26x8xf32> to vector<26x8xbf16>
    %c0_5 = arith.constant 0 : index
    %c0_6 = arith.constant 0 : index
    %7 = vector.load %arg5[%c0_5, %c0_6] : memref<8x32xf32, #tpu.memory_space<vmem>>, vector<8x32xf32>
    %8 = arith.truncf %7 : vector<8x32xf32> to vector<8x32xbf16>
    %cst_7 = arith.constant dense<0.000000e+00> : vector<26x32xf32>
    %9 = tpu.matmul %6, %8, %cst_7 {dimension_numbers = #tpu.dot_dimension_numbers<[1], [0], [0], [1], [0, 0, 1, 1], [], []>} : vector<26x8xbf16>, vector<8x32xbf16>, vector<26x32xf32> -> vector<26x32xf32>
    %10 = arith.addf %4, %9 : vector<26x32xf32>
    %c0_8 = arith.constant 0 : index
    %c0_9 = arith.constant 0 : index
    %11 = vector.load %arg3[%c0_8, %c0_9] : memref<26x8xf32, #tpu.memory_space<vmem>>, vector<26x8xf32>
    %12 = arith.truncf %11 : vector<26x8xf32> to vector<26x8xbf16>
    %c0_10 = arith.constant 0 : index
    %c0_11 = arith.constant 0 : index
    %13 = vector.load %arg6[%c0_10, %c0_11] : memref<8x32xf32, #tpu.memory_space<vmem>>, vector<8x32xf32>
    %14 = arith.truncf %13 : vector<8x32xf32> to vector<8x32xbf16>
    %cst_12 = arith.constant dense<0.000000e+00> : vector<26x32xf32>
    %15 = tpu.matmul %12, %14, %cst_12 {dimension_numbers = #tpu.dot_dimension_numbers<[1], [0], [0], [1], [0, 0, 1, 1], [], []>} : vector<26x8xbf16>, vector<8x32xbf16>, vector<26x32xf32> -> vector<26x32xf32>
    %16 = arith.addf %10, %15 : vector<26x32xf32>
    %c0_13 = arith.constant 0 : index
    %c0_14 = arith.constant 0 : index
    %17 = vector.load %arg7[%c0_13, %c0_14] : memref<1x32xf32, #tpu.memory_space<vmem>>, vector<1x32xf32>
    %18 = vector.broadcast %17 : vector<1x32xf32> to vector<26x32xf32>
    %19 = arith.addf %16, %18 : vector<26x32xf32>
    %c0_15 = arith.constant 0 : index
    %c0_16 = arith.constant 0 : index
    %20 = vector.load %arg8[%c0_15, %c0_16] : memref<26x32xf32, #tpu.memory_space<vmem>>, vector<26x32xf32>
    tpu.vector_store %arg8[%c0_15, %c0_16], %19 {strides = array<i32>} : memref<26x32xf32, #tpu.memory_space<vmem>>, vector<26x32xf32>,
    return
  }
  func.func @transform_0(%arg0: i32) -> (i32, i32) {
    %c0_i32 = arith.constant 0 : i32
    %c0_i32_0 = arith.constant 0 : i32
    return %arg0, %c0_i32 : i32, i32
  }
  func.func @transform_1(%arg0: i32) -> (i32, i32) {
    %c0_i32 = arith.constant 0 : i32
    %c0_i32_0 = arith.constant 0 : i32
    return %arg0, %c0_i32 : i32, i32
  }
  func.func @transform_2(%arg0: i32) -> (i32, i32) {
    %c0_i32 = arith.constant 0 : i32
    %c0_i32_0 = arith.constant 0 : i32
    return %arg0, %c0_i32 : i32, i32
  }
  func.func @transform_3(%arg0: i32) -> (i32, i32) {
    %c0_i32 = arith.constant 0 : i32
    %c0_i32_0 = arith.constant 0 : i32
    %c0_i32_1 = arith.constant 0 : i32
    return %c0_i32, %c0_i32_0 : i32, i32
  }
  func.func @transform_4(%arg0: i32) -> (i32, i32) {
    %c0_i32 = arith.constant 0 : i32
    %c0_i32_0 = arith.constant 0 : i32
    %c0_i32_1 = arith.constant 0 : i32
    return %c0_i32, %c0_i32_0 : i32, i32
  }
  func.func @transform_5(%arg0: i32) -> (i32, i32) {
    %c0_i32 = arith.constant 0 : i32
    %c0_i32_0 = arith.constant 0 : i32
    %c0_i32_1 = arith.constant 0 : i32
    return %c0_i32, %c0_i32_0 : i32, i32
  }
  func.func @transform_6(%arg0: i32) -> (i32, i32) {
    %c0_i32 = arith.constant 0 : i32
    %c0_i32_0 = arith.constant 0 : i32
    %c0_i32_1 = arith.constant 0 : i32
    return %c0_i32, %c0_i32_0 : i32, i32
  }
  func.func @transform_7(%arg0: i32) -> (i32, i32) {
    %c0_i32 = arith.constant 0 : i32
    %c0_i32_0 = arith.constant 0 : i32
    return %arg0, %c0_i32 : i32, i32
  }
}

</mosaic_0001>

<bundles_post_ra>
// kernel: tpu_custom_call.1
= control target key start
LH: loop header
LB: loop body
LE: loop exit
PB: predicated region body
PF: predicated region fallthrough
CT: control target
= control target key end

     0   :  { %vm52_vm0 = vcmask 1043456   ;;  %vm75_vm1 = vcmask 130048   ;;  %vm45_vm2 = vcmask 64512   ;;  %s318_s0 = inlined_call_operand.vmem [shape: f32[26,16], index: 0, kind: input, shape index: {}]   ;;  %s319_s1 = inlined_call_operand.vmem [shape: f32[26,8], index: 1, kind: input, shape index: {}]   ;;  %s320_s2 = inlined_call_operand.vmem [shape: f32[26,8], index: 2, kind: input, shape index: {}]   ;;  %s321_s3 = inlined_call_operand.vmem [shape: f32[16,32], index: 3, kind: input, shape index: {}]   ;;  %s322_s4 = inlined_call_operand.vmem [shape: f32[8,32], index: 4, kind: input, shape index: {}]   ;;  %s323_s5 = inlined_call_operand.vmem [shape: f32[8,32], index: 5, kind: input, shape index: {}]   ;;  %s324_s6 = inlined_call_operand.vmem [shape: f32[1,32], index: 6, kind: input, shape index: {}]   ;;  %s325_s7 = inlined_call_operand.hbm [shape: f32[26,32], index: 7, kind: output, shape index: {}]  }
   0x1   :  { %v34_v0 = vld [vmem:[%s321_s3] sm:$0xff]  ;;  %v35_v1 = vld [vmem:[%s321_s3 + $0x8] sm:$0xff]  ;;  %v39_v16 = vld [vmem:[%s319_s1 + $0x10] sm:$0xff] }
   0x2   :  { %v43_v2 = vld [vmem:[%s322_s4] sm:$0xff]  ;;  %v36_v3 = vpack.c.bf16 %v35_v1, %v34_v0  ;;  %v29_v7 = vld [vmem:[%s318_s0 + $0x8] sm:$0xff]  ;;  %v40_v17 = vld [vmem:[%s319_s1 + $0x18] sm:$0x3] }
   0x3   :  { %v44_v4 = vpack.c.bf16 %v43_v2, %v43_v2  ;;  %v107_v5 = vld [vmem:[%s323_s5] sm:$0xff]  ;;  %v38_v11 = vld [vmem:[%s319_s1 + $0x8] sm:$0xff]  ;;  %v42_v20 = vpack.c.bf16 %v40_v17, %v39_v16 }
   0x4   :  { %v28_v6 = vld [vmem:[%s318_s0] sm:$0xff]  ;;  %v108_v8 = vpack.c.bf16 %v107_v5, %v107_v5  ;;  %89 = vmatpush.bf16.msra.mxu1 %v36_v3  ;;  %v102_v15 = vld [vmem:[%s320_s2 + $0x8] sm:$0xff] }
   0x5   :  { %v32_v9 = vpack.c.bf16 %v29_v7, %v28_v6  ;;  %v37_v10 = vld [vmem:[%s319_s1] sm:$0xff]  ;;  %v54_v13 = vsel %vm52_vm0, %v44_v4, 0 }
   0x6   :  { %v101_v12 = vld [vmem:[%s320_s2] sm:$0xff]  ;;  %v41_v14 = vpack.c.bf16 %v38_v11, %v37_v10  ;;  %63 = vmatpush.bf16.msra.mxu0 %v54_v13  ;;  %v116_v18 = vsel %vm52_vm0, %v108_v8, 0  ;;  %179 = vmatpush.bf16.msra.mxu3 %v54_v13 }
   0x7   :  { %v105_v19 = vpack.c.bf16 %v102_v15, %v101_v12  ;;  %125 = vmatpush.bf16.msra.mxu2 %v116_v18 }
   0x8   :  { %12 = vsyncpa [#allocation3], 0  ;;  %175 = vmatmul.msk.bf16.vlgmr.msra.gmra.mxu1 %vm75_vm1, %v32_v9  ;;  %v30_v21 = vld [vmem:[%s318_s0 + $0x10] sm:$0xff]  ;;  %v31_v22 = vld [vmem:[%s318_s0 + $0x18] sm:$0x3]  ;;  %vm149_vm3 = vcmask 261120  }
   0x9   :  { %173 = vmatmul.msk.bf16.vlgmr.msra.gmra.mxu0 %vm45_vm2, %v41_v14  ;;  %174 = vmatmul.msk.bf16.vlgmr.msra.gmra.mxu3 %vm45_vm2, %v42_v20  ;;  %v103_v23 = vld [vmem:[%s320_s2 + $0x10] sm:$0xff]  ;;  %v104_v24 = vld [vmem:[%s320_s2 + $0x18] sm:$0x3]  ;;  %v33_v25 = vpack.c.bf16 %v31_v22, %v30_v21  ;;  %v183_v30 = vld [vmem:[%s324_s6] ss:$0 sm:$0xff]  ;;  %s210_s0 = smov [#allocation2]  }
   0xa   :  { %177 = vmatmul.msk.bf16.vlgmr.msra.gmra.mxu2 %vm45_vm2, %v105_v19  ;;  %v106_v26 = vpack.c.bf16 %v104_v24, %v103_v23  ;;  %s159_s2 = sshll.u32 %s210_s0, 4  ;;  %s161_s9 = sshll.u32 %s325_s7, 4  ;;  %vm153_vm4 = vcmask 254976   ;;  %s160_s2 = int_to_ptr.vmem [resolvable:$true] %s159_s2  ;;  %s162_s9 = int_to_ptr.hbm [resolvable:$true] %s161_s9 }
   0xb   :  { %s211_s10 = smov 128   ;;  %s212_s11 = smov 8  }
  0x18   :  { %176 = vmatmul.msk.bf16.gmra.mxu1 %vm75_vm1, %v33_v25 }
  0x1a   :  { %178 = vmatmul.msk.bf16.gmra.mxu2 %vm45_vm2, %v106_v26 }
  0x85   :  { %v91_v27 = vpop.f32.mrf.mxu1 }
  0x86   :  { %v65_v28 = vpop.f32.mrf.mxu0 }
  0x87   :  { %v92_v29 = vadd.f32 %v91_v27, %v65_v28 }
  0x8c   :  { %v70_v41 = vpop.f32.mrf.mxu3 }
  0x8d   :  { %v127_v31 = vpop.f32.mrf.mxu2  ;;  %v93_v32 = vpop.f32.mrf.mxu1 }
  0x8e   :  { %v137_v33 = vadd.f32 %v127_v31, %v92_v29  ;;  %v67_v35 = vpop.f32.mrf.mxu0 }
  0x8f   :  { %v94_v36 = vadd.f32 %v93_v32, %v67_v35 }
  0x90   :  { %v145_v34 = vadd.f32 %v183_v30, %v137_v33 }
  0x92   :  { %150 = vst.msk [vmem:[#allocation2] sm:$0xff] %vm149_vm3, %v145_v34 }
  0x94   :  { %v72_v47 = vpop.f32.mrf.mxu3 }
  0x95   :  { %v129_v37 = vpop.f32.mrf.mxu2  ;;  %v96_v39 = vpop.f32.mrf.mxu1 }
  0x96   :  { %v138_v38 = vadd.f32 %v129_v37, %v94_v36  ;;  %v97_v42 = vadd.f32 %v96_v39, %v70_v41 }
  0x98   :  { %v146_v40 = vadd.f32 %v183_v30, %v138_v38 }
  0x9a   :  { %151 = vst.msk [vmem:[#allocation2 + $0x8] sm:$0xff] %vm149_vm3, %v146_v40 }
  0x9d   :  { %v132_v43 = vpop.f32.mrf.mxu2  ;;  %v98_v46 = vpop.f32.mrf.mxu1 }
  0x9e   :  { %v139_v44 = vadd.f32 %v132_v43, %v97_v42  ;;  %v99_v48 = vadd.f32 %v98_v46, %v72_v47 }
  0xa0   :  { %v147_v45 = vadd.f32 %v183_v30, %v139_v44 }
  0xa2   :  { %152 = vst.msk [vmem:[#allocation2 + $0x10] sm:$0xff] %vm149_vm3, %v147_v45 }
  0xa5   :  { %v134_v49 = vpop.f32.mrf.mxu2 }
  0xa6   :  { %v140_v50 = vadd.f32 %v134_v49, %v99_v48 }
  0xa8   :  { %v148_v51 = vadd.f32 %v183_v30, %v140_v50 }
  0xaa   :  { %154 = vst.msk [vmem:[#allocation2 + $0x18] sm:$0x3] %vm153_vm4, %v148_v51 }
  0xab   :  { %167 = dma.vmem_to_hbm [thread:$0]  %s160_s2, 512, %s162_s9, [#allocation3], %s211_s10, %s211_s10, %s212_s11  }
  0xac   :  { %208 = dma.done.wait [#allocation3], 512  }
  0xad   :  { %209 = vsyncadd [#allocation3], 4294966784 }
  0xae   :  { %172 = vsyncpa [#allocation3], 1 }

</bundles_post_ra>
